<compile_context>
chip_gen: v6e
topology: v6e:2x2x1
jax: 0.10.0
libtpu: 0.0.40
codegen_flags: <defaults>
</compile_context>

<pallas_src>
import functools

import jax
import jax.numpy as jnp
from jax.experimental import pallas as pl
from jax.experimental.pallas import tpu as pltpu

IN_FEATURES = 4 * 32 * 1    # 128
CLASSES = 23                # matches the Classifier module
PADDED_CLASSES = 128        # lane-dense output width (multiple of 128)


def _round_up(n, m):
    return ((n + m - 1) // m) * m


def _mlp_softmax_kernel(x_ref, w1_ref, b1_ref, w2_ref, b2_ref,
                        w3_ref, b3_ref, mask_ref, o_ref):
    # x tile: (TB, 128) f32; cast to bf16 on-chip (free under the HBM bound).
    # Weights (bf16), biases (f32) and the class mask are grid-invariant
    # (index_map -> (0, 0)), so they stay VMEM-resident across grid steps.
    x = x_ref[...].astype(jnp.bfloat16)

    # Linear 1 + ReLU  (bf16 MXU matmul, f32 accumulate)
    h1 = jnp.dot(x, w1_ref[...], preferred_element_type=jnp.float32) + b1_ref[...]
    h1 = jnp.maximum(h1, 0.0)

    # Linear 2 + ReLU
    h2 = jnp.dot(h1.astype(jnp.bfloat16), w2_ref[...],
                 preferred_element_type=jnp.float32) + b2_ref[...]
    h2 = jnp.maximum(h2, 0.0)

    # Linear 3 (padded to 128 output lanes) + ReLU
    logits = jnp.dot(h2.astype(jnp.bfloat16), w3_ref[...],
                     preferred_element_type=jnp.float32) + b3_ref[...]
    logits = jnp.maximum(logits, 0.0)

    # Numerically stable softmax over the class axis (dim=1).
    # Padded lanes are exactly 0 after ReLU (zero weights/bias) and real lanes
    # are >= 0, so max over all 128 lanes equals max over the real 23 lanes.
    m = jnp.max(logits, axis=-1, keepdims=True)
    e = jnp.exp(logits - m) * mask_ref[...]      # zero out padded lanes
    denom = jnp.sum(e, axis=-1, keepdims=True)
    o_ref[...] = (e * pl.reciprocal(denom)).astype(o_ref.dtype)


def prepare_params(params):
    """One-time kernel-layout prep (hoisted out of the per-call path):
    [in,out] bf16 weights, f32 (1,N) biases, zero-padded last layer to 128
    lanes, and a (1,128) 0/1 class mask."""
    w1, b1, w2, b2, w3, b3 = params
    w3p = jnp.zeros((IN_FEATURES, PADDED_CLASSES), jnp.float32)
    w3p = w3p.at[:, :CLASSES].set(w3.astype(jnp.float32))
    b3p = jnp.zeros((1, PADDED_CLASSES), jnp.float32)
    b3p = b3p.at[:, :CLASSES].set(b3.reshape(1, -1).astype(jnp.float32))
    mask = (jnp.arange(PADDED_CLASSES) < CLASSES).astype(jnp.float32)
    return (w1.astype(jnp.bfloat16), b1.reshape(1, -1).astype(jnp.float32),
            w2.astype(jnp.bfloat16), b2.reshape(1, -1).astype(jnp.float32),
            w3p.astype(jnp.bfloat16), b3p, mask.reshape(1, PADDED_CLASSES))


@functools.partial(jax.jit, static_argnames=("block_rows",))
def discriminator_forward(x, prepared, *, block_rows=4096):
    """x: [B, 128] float32 -> [B, CLASSES] float32 softmax probabilities."""
    w1, b1, w2, b2, w3p, b3p, mask = prepared
    B = x.shape[0]

    # Batch tiling: size the row tile from cdiv(B, n_blocks) so we pad at most
    # a handful of rows (not up to a full tile). Keep >= 2 grid steps when the
    # batch is big enough so both v7x TensorCores get work.
    b8 = _round_up(max(B, 8), 8)
    n_blocks = pl.cdiv(b8, block_rows)
    if b8 >= 512:
        n_blocks = max(n_blocks, 2)
    row_align = 8 if n_blocks == 1 else 16   # bf16 output sublane packing
    tb = _round_up(pl.cdiv(b8, n_blocks), row_align)
    b_pad = n_blocks * tb
    if b_pad != B:
        x = jnp.pad(x, ((0, b_pad - B), (0, 0)))

    resident = lambda shape: pl.BlockSpec(shape, lambda i: (0, 0))

    cost = pl.CostEstimate(
        flops=2 * b_pad * IN_FEATURES * (2 * IN_FEATURES + PADDED_CLASSES),
        transcendentals=b_pad * (PADDED_CLASSES + 1),   # exp + reciprocal
        bytes_accessed=(b_pad * IN_FEATURES * 4                       # x (f32)
                        + (w1.size + w2.size + w3p.size) * 2          # bf16 W
                        + (b1.size + b2.size + b3p.size + mask.size) * 4
                        + b_pad * PADDED_CLASSES * 2),                # out bf16
    )

    out = pl.pallas_call(
        _mlp_softmax_kernel,
        out_shape=jax.ShapeDtypeStruct((b_pad, PADDED_CLASSES), jnp.bfloat16),
        grid=(n_blocks,),
        in_specs=[
            pl.BlockSpec((tb, IN_FEATURES), lambda i: (i, 0)),   # x (row-tiled)
            resident((IN_FEATURES, IN_FEATURES)),                # w1
            resident((1, IN_FEATURES)),                          # b1
            resident((IN_FEATURES, IN_FEATURES)),                # w2
            resident((1, IN_FEATURES)),                          # b2
            resident((IN_FEATURES, PADDED_CLASSES)),             # w3 (padded)
            resident((1, PADDED_CLASSES)),                       # b3 (padded)
            resident((1, PADDED_CLASSES)),                       # class mask
        ],
        out_specs=pl.BlockSpec((tb, PADDED_CLASSES), lambda i: (i, 0)),
        compiler_params=pltpu.CompilerParams(
            dimension_semantics=("parallel",)),
        cost_estimate=cost,
    )(x, w1, b1, w2, b2, w3p, b3p, mask)

    return out[:B, :CLASSES].astype(jnp.float32)


def init_params(key):
    """Deterministic synthetic params, PyTorch-Linear-style uniform ranges."""
    ks = jax.random.split(key, 6)

    def lin(kw, kb, fan_in, fan_out):
        bound = 1.0 / jnp.sqrt(fan_in)
        w = jax.random.uniform(kw, (fan_in, fan_out), jnp.float32, -bound, bound)
        b = jax.random.uniform(kb, (1, fan_out), jnp.float32, -bound, bound)
        return w, b

    w1, b1 = lin(ks[0], ks[1], IN_FEATURES, IN_FEATURES)
    w2, b2 = lin(ks[2], ks[3], IN_FEATURES, IN_FEATURES)
    w3, b3 = lin(ks[4], ks[5], IN_FEATURES, CLASSES)
    return (w1, b1, w2, b2, w3, b3)


def _reference(x, params):
    """Pure-f32 reference matching the PyTorch module semantics."""
    w1, b1, w2, b2, w3, b3 = params
    h1 = jax.nn.relu(x @ w1 + b1)
    h2 = jax.nn.relu(h1 @ w2 + b2)
    lg = jax.nn.relu(h2 @ w3 + b3)
    return jax.nn.softmax(lg, axis=1)


if __name__ == "__main__":
    key = jax.random.PRNGKey(0)
    k_x, k_p = jax.random.split(key)
    B = 8
    x = jax.random.normal(k_x, (B, IN_FEATURES), jnp.float32)
    params = init_params(k_p)
    prepared = prepare_params(params)

    out = discriminator_forward(x, prepared)
    out = jax.block_until_ready(out)

    ref = _reference(x, params)
    assert out.shape == (B, CLASSES)
    # bf16 matmul inputs + bf16 output -> loosened tolerance vs the pure-f32
    # reference (outputs are probabilities in [0, 1]).
    assert jnp.allclose(out, ref, atol=3e-2, rtol=5e-2)
    assert jnp.allclose(jnp.sum(out, axis=1), jnp.ones((B,)), atol=1e-2)

    print("KERNEL_OK")
</pallas_src>

<mosaic_0001>
module attributes {stable_mosaic.version = 11 : i64} {
  func.func @_mlp_softmax_kernel(%arg0: i32, %arg1: memref<8x128xf32, #tpu.memory_space<vmem>>, %arg2: memref<128x128xbf16, #tpu.memory_space<vmem>>, %arg3: memref<1x128xf32, #tpu.memory_space<vmem>>, %arg4: memref<128x128xbf16, #tpu.memory_space<vmem>>, %arg5: memref<1x128xf32, #tpu.memory_space<vmem>>, %arg6: memref<128x128xbf16, #tpu.memory_space<vmem>>, %arg7: memref<1x128xf32, #tpu.memory_space<vmem>>, %arg8: memref<1x128xf32, #tpu.memory_space<vmem>>, %arg9: memref<8x128xbf16, #tpu.memory_space<vmem>>) attributes {dimension_semantics = [#tpu.dimension_semantics<parallel>], iteration_bounds = array<i64: 1>, scalar_prefetch = 0 : i64, scratch_operands = 0 : i64, tpu.core_type = #tpu.core_type<tc>, window_params = [{transform_indices = @transform_0, window_bounds = array<i64: 8, 128>}, {pipeline_mode = #tpu.pipeline_mode<synchronous>, transform_indices = @transform_1, window_bounds = array<i64: 128, 128>}, {pipeline_mode = #tpu.pipeline_mode<synchronous>, transform_indices = @transform_2, window_bounds = array<i64: 1, 128>}, {pipeline_mode = #tpu.pipeline_mode<synchronous>, transform_indices = @transform_3, window_bounds = array<i64: 128, 128>}, {pipeline_mode = #tpu.pipeline_mode<synchronous>, transform_indices = @transform_4, window_bounds = array<i64: 1, 128>}, {pipeline_mode = #tpu.pipeline_mode<synchronous>, transform_indices = @transform_5, window_bounds = array<i64: 128, 128>}, {pipeline_mode = #tpu.pipeline_mode<synchronous>, transform_indices = @transform_6, window_bounds = array<i64: 1, 128>}, {pipeline_mode = #tpu.pipeline_mode<synchronous>, transform_indices = @transform_7, window_bounds = array<i64: 1, 128>}, {transform_indices = @transform_8, window_bounds = array<i64: 8, 128>}]} {
    %c0 = arith.constant 0 : index
    %c0_0 = arith.constant 0 : index
    %0 = vector.load %arg1[%c0, %c0_0] : memref<8x128xf32, #tpu.memory_space<vmem>>, vector<8x128xf32>
    %1 = arith.truncf %0 : vector<8x128xf32> to vector<8x128xbf16>
    %c0_1 = arith.constant 0 : index
    %c0_2 = arith.constant 0 : index
    %2 = vector.load %arg2[%c0_1, %c0_2] : memref<128x128xbf16, #tpu.memory_space<vmem>>, vector<128x128xbf16>
    %cst = arith.constant dense<0.000000e+00> : vector<8x128xf32>
    %3 = tpu.matmul %1, %2, %cst {dimension_numbers = #tpu.dot_dimension_numbers<[1], [0], [0], [1], [0, 0, 1, 1], [], []>} : vector<8x128xbf16>, vector<128x128xbf16>, vector<8x128xf32> -> vector<8x128xf32>
    %c0_3 = arith.constant 0 : index
    %c0_4 = arith.constant 0 : index
    %4 = vector.load %arg3[%c0_3, %c0_4] : memref<1x128xf32, #tpu.memory_space<vmem>>, vector<1x128xf32>
    %5 = vector.broadcast %4 : vector<1x128xf32> to vector<8x128xf32>
    %6 = arith.addf %3, %5 : vector<8x128xf32>
    %cst_5 = arith.constant 0.000000e+00 : f32
    %7 = vector.broadcast %cst_5 : f32 to vector<8x128xf32>
    %8 = arith.maximumf %6, %7 : vector<8x128xf32>
    %9 = arith.truncf %8 : vector<8x128xf32> to vector<8x128xbf16>
    %c0_6 = arith.constant 0 : index
    %c0_7 = arith.constant 0 : index
    %10 = vector.load %arg4[%c0_6, %c0_7] : memref<128x128xbf16, #tpu.memory_space<vmem>>, vector<128x128xbf16>
    %cst_8 = arith.constant dense<0.000000e+00> : vector<8x128xf32>
    %11 = tpu.matmul %9, %10, %cst_8 {dimension_numbers = #tpu.dot_dimension_numbers<[1], [0], [0], [1], [0, 0, 1, 1], [], []>} : vector<8x128xbf16>, vector<128x128xbf16>, vector<8x128xf32> -> vector<8x128xf32>
    %c0_9 = arith.constant 0 : index
    %c0_10 = arith.constant 0 : index
    %12 = vector.load %arg5[%c0_9, %c0_10] : memref<1x128xf32, #tpu.memory_space<vmem>>, vector<1x128xf32>
    %13 = vector.broadcast %12 : vector<1x128xf32> to vector<8x128xf32>
    %14 = arith.addf %11, %13 : vector<8x128xf32>
    %cst_11 = arith.constant 0.000000e+00 : f32
    %15 = vector.broadcast %cst_11 : f32 to vector<8x128xf32>
    %16 = arith.maximumf %14, %15 : vector<8x128xf32>
    %17 = arith.truncf %16 : vector<8x128xf32> to vector<8x128xbf16>
    %c0_12 = arith.constant 0 : index
    %c0_13 = arith.constant 0 : index
    %18 = vector.load %arg6[%c0_12, %c0_13] : memref<128x128xbf16, #tpu.memory_space<vmem>>, vector<128x128xbf16>
    %cst_14 = arith.constant dense<0.000000e+00> : vector<8x128xf32>
    %19 = tpu.matmul %17, %18, %cst_14 {dimension_numbers = #tpu.dot_dimension_numbers<[1], [0], [0], [1], [0, 0, 1, 1], [], []>} : vector<8x128xbf16>, vector<128x128xbf16>, vector<8x128xf32> -> vector<8x128xf32>
    %c0_15 = arith.constant 0 : index
    %c0_16 = arith.constant 0 : index
    %20 = vector.load %arg7[%c0_15, %c0_16] : memref<1x128xf32, #tpu.memory_space<vmem>>, vector<1x128xf32>
    %21 = vector.broadcast %20 : vector<1x128xf32> to vector<8x128xf32>
    %22 = arith.addf %19, %21 : vector<8x128xf32>
    %cst_17 = arith.constant 0.000000e+00 : f32
    %23 = vector.broadcast %cst_17 : f32 to vector<8x128xf32>
    %24 = arith.maximumf %22, %23 : vector<8x128xf32>
    %cst_18 = arith.constant dense<0xFF800000> : vector<8xf32>
    %25 = vector.multi_reduction <maximumf>, %24, %cst_18 [1] : vector<8x128xf32> to vector<8xf32>
    %26 = vector.shape_cast %25 : vector<8xf32> to vector<8x1xf32>
    %27 = vector.broadcast %26 : vector<8x1xf32> to vector<8x128xf32>
    %28 = arith.subf %24, %27 : vector<8x128xf32>
    %29 = math.exp %28 : vector<8x128xf32>
    %c0_19 = arith.constant 0 : index
    %c0_20 = arith.constant 0 : index
    %30 = vector.load %arg8[%c0_19, %c0_20] : memref<1x128xf32, #tpu.memory_space<vmem>>, vector<1x128xf32>
    %31 = vector.broadcast %30 : vector<1x128xf32> to vector<8x128xf32>
    %32 = arith.mulf %29, %31 : vector<8x128xf32>
    %cst_21 = arith.constant dense<0.000000e+00> : vector<8xf32>
    %33 = vector.multi_reduction <add>, %32, %cst_21 [1] : vector<8x128xf32> to vector<8xf32>
    %34 = vector.shape_cast %33 : vector<8xf32> to vector<8x1xf32>
    %35 = tpu.reciprocal %34 : vector<8x1xf32> -> vector<8x1xf32>
    %36 = vector.broadcast %35 : vector<8x1xf32> to vector<8x128xf32>
    %37 = arith.mulf %32, %36 : vector<8x128xf32>
    %38 = arith.truncf %37 : vector<8x128xf32> to vector<8x128xbf16>
    %c0_22 = arith.constant 0 : index
    %c0_23 = arith.constant 0 : index
    %39 = vector.load %arg9[%c0_22, %c0_23] : memref<8x128xbf16, #tpu.memory_space<vmem>>, vector<8x128xbf16>
    tpu.vector_store %arg9[%c0_22, %c0_23], %38 {strides = array<i32>} : memref<8x128xbf16, #tpu.memory_space<vmem>>, vector<8x128xbf16>,
    return
  }
  func.func @transform_0(%arg0: i32) -> (i32, i32) {
    %c0_i32 = arith.constant 0 : i32
    %c0_i32_0 = arith.constant 0 : i32
    return %arg0, %c0_i32 : i32, i32
  }
  func.func @transform_1(%arg0: i32) -> (i32, i32) {
    %c0_i32 = arith.constant 0 : i32
    %c0_i32_0 = arith.constant 0 : i32
    %c0_i32_1 = arith.constant 0 : i32
    return %c0_i32, %c0_i32_0 : i32, i32
  }
  func.func @transform_2(%arg0: i32) -> (i32, i32) {
    %c0_i32 = arith.constant 0 : i32
    %c0_i32_0 = arith.constant 0 : i32
    %c0_i32_1 = arith.constant 0 : i32
    return %c0_i32, %c0_i32_0 : i32, i32
  }
  func.func @transform_3(%arg0: i32) -> (i32, i32) {
    %c0_i32 = arith.constant 0 : i32
    %c0_i32_0 = arith.constant 0 : i32
    %c0_i32_1 = arith.constant 0 : i32
    return %c0_i32, %c0_i32_0 : i32, i32
  }
  func.func @transform_4(%arg0: i32) -> (i32, i32) {
    %c0_i32 = arith.constant 0 : i32
    %c0_i32_0 = arith.constant 0 : i32
    %c0_i32_1 = arith.constant 0 : i32
    return %c0_i32, %c0_i32_0 : i32, i32
  }
  func.func @transform_5(%arg0: i32) -> (i32, i32) {
    %c0_i32 = arith.constant 0 : i32
    %c0_i32_0 = arith.constant 0 : i32
    %c0_i32_1 = arith.constant 0 : i32
    return %c0_i32, %c0_i32_0 : i32, i32
  }
  func.func @transform_6(%arg0: i32) -> (i32, i32) {
    %c0_i32 = arith.constant 0 : i32
    %c0_i32_0 = arith.constant 0 : i32
    %c0_i32_1 = arith.constant 0 : i32
    return %c0_i32, %c0_i32_0 : i32, i32
  }
  func.func @transform_7(%arg0: i32) -> (i32, i32) {
    %c0_i32 = arith.constant 0 : i32
    %c0_i32_0 = arith.constant 0 : i32
    %c0_i32_1 = arith.constant 0 : i32
    return %c0_i32, %c0_i32_0 : i32, i32
  }
  func.func @transform_8(%arg0: i32) -> (i32, i32) {
    %c0_i32 = arith.constant 0 : i32
    %c0_i32_0 = arith.constant 0 : i32
    return %arg0, %c0_i32 : i32, i32
  }
}

</mosaic_0001>

<bundles_post_ra>
// kernel: discriminator_forward.1
= control target key start
LH: loop header
LB: loop body
LE: loop exit
PB: predicated region body
PF: predicated region fallthrough
CT: control target
= control target key end

     0   :  { %13 = vsyncpa [#allocation3], 0  ;;  %s805_s0 = inlined_call_operand.hbm [shape: f32[8,128], index: 0, kind: input, shape index: {}]   ;;  %s806_s1 = inlined_call_operand.hbm [shape: bf16[128,128], index: 1, kind: input, shape index: {}]   ;;  %s807_s2 = inlined_call_operand.vmem [shape: f32[1,128], index: 2, kind: input, shape index: {}]   ;;  %s808_s3 = inlined_call_operand.hbm [shape: bf16[128,128], index: 3, kind: input, shape index: {}]   ;;  %s809_s4 = inlined_call_operand.vmem [shape: f32[1,128], index: 4, kind: input, shape index: {}]   ;;  %s810_s5 = inlined_call_operand.hbm [shape: bf16[128,128], index: 5, kind: input, shape index: {}]   ;;  %s811_s6 = inlined_call_operand.vmem [shape: f32[1,128], index: 6, kind: input, shape index: {}]   ;;  %s812_s7 = inlined_call_operand.vmem [shape: f32[1,128], index: 7, kind: input, shape index: {}]   ;;  %s813_s8 = inlined_call_operand.vmem [shape: bf16[8,128], index: 8, kind: output, shape index: {}]  }
   0x1   :  { %14 = vsyncpa [#allocation5], 0 }
   0x2   :  { %15 = vsyncpa [#allocation8], 0  ;;  %s686_s27 = smov [#allocation4]  }
   0x3   :  { %s31_s28 = sshll.u32 %s686_s27, 4  ;;  %s32_s28 = int_to_ptr.vmem [resolvable:$true] %s31_s28 }
   0x4   :  { %s608_s29 = scalar_lea.vmem %s32_s28, 1024  ;;  %p613_p1 = scmp.lt.s32.totalorder %s32_s28, %s32_s28 }
   0x5   :  { %p609_p0 = scmp.ne.s32.totalorder %s32_s28, %s608_s29  ;;  %p614_p2 = scmp.lt.s32.totalorder %s608_s29, %s608_s29 }
   0x7   :  { %p615_p3 = por %p614_p2, %p613_p1 }
   0x9   :  { %p616_p4 = pnand %p615_p3, %p609_p0 }
   0xb   :  { %619 = shalt.err (!%p616_p4)
}
   0xc   :  { %s687_s30 = smov 64   ;;  %s688_s9 = smov 4  }
   0xd   :  { %37 = dma.hbm_to_vmem [thread:$0]  %s806_s1, 1024, %s32_s28, [#allocation5], %s687_s30, %s687_s30, %s688_s9  }
   0xe   :  { %s689_s12 = smov [#allocation2]   ;;  %s690_s14 = smov [#allocation6]  }
   0xf   :  { %s22_s13 = sshll.u32 %s689_s12, 4  ;;  %s45_s15 = sshll.u32 %s690_s14, 4  ;;  %s23_s13 = int_to_ptr.vmem [resolvable:$true] %s22_s13  ;;  %s46_s15 = int_to_ptr.vmem [resolvable:$true] %s45_s15 }
  0x10   :  { %s628_s16 = scalar_lea.vmem %s23_s13, 128  ;;  %p633_p6 = scmp.lt.s32.totalorder %s23_s13, %s23_s13 }
  0x11   :  { %p629_p5 = scmp.ne.s32.totalorder %s23_s13, %s628_s16  ;;  %p634_p7 = scmp.lt.s32.totalorder %s628_s16, %s628_s16 }
  0x13   :  { %p635_p8 = por %p634_p7, %p633_p6 }
  0x15   :  { %p636_p9 = pnand %p635_p8, %p629_p5 }
  0x17   :  { %639 = shalt.err (!%p636_p9)
}
  0x18   :  { %25 = dma.hbm_to_vmem [thread:$0]  %s805_s0, 128, %s23_s13, [#allocation3]  }
  0x19   :  { %s648_s19 = scalar_lea.vmem %s46_s15, 1024  ;;  %p653_p11 = scmp.lt.s32.totalorder %s46_s15, %s46_s15 }
  0x1a   :  { %p649_p10 = scmp.ne.s32.totalorder %s46_s15, %s648_s19  ;;  %p654_p12 = scmp.lt.s32.totalorder %s648_s19, %s648_s19 }
  0x1c   :  { %p655_p13 = por %p654_p12, %p653_p11 }
  0x1e   :  { %p656_p0 = pnand %p655_p13, %p649_p10 }
  0x20   :  { %659 = shalt.err (!%p656_p0)
}
  0x21   :  { %51 = dma.hbm_to_vmem [thread:$0]  %s808_s3, 1024, %s46_s15, [#allocation5], %s687_s30, %s687_s30, %s688_s9  }
  0x22   :  { %s691_s21 = smov [#allocation7]  }
  0x23   :  { %s59_s22 = sshll.u32 %s691_s21, 4  ;;  %s60_s22 = int_to_ptr.vmem [resolvable:$true] %s59_s22 }
  0x24   :  { %s668_s23 = scalar_lea.vmem %s60_s22, 1024  ;;  %p673_p2 = scmp.lt.s32.totalorder %s60_s22, %s60_s22 }
  0x25   :  { %p669_p1 = scmp.ne.s32.totalorder %s60_s22, %s668_s23  ;;  %p674_p3 = scmp.lt.s32.totalorder %s668_s23, %s668_s23 }
  0x27   :  { %p675_p4 = por %p674_p3, %p673_p2 }
  0x29   :  { %p676_p5 = pnand %p675_p4, %p669_p1 }
  0x2b   :  { %679 = shalt.err (!%p676_p5)
}
  0x2c   :  { %65 = dma.hbm_to_vmem [thread:$0]  %s810_s5, 1024, %s60_s22, [#allocation8], %s687_s30, %s687_s30, %s688_s9  }
  0x2d   :  { %680 = dma.done.wait [#allocation3], 128  }
  0x2e   :  { %681 = vsyncadd [#allocation3], 4294967168 }
  0x2f   :  { %682 = dma.done.wait [#allocation5], 2048  }
  0x30   :  { %683 = vsyncadd [#allocation5], 4294965248 }
  0x31   :  { %684 = dma.done.wait [#allocation8], 1024  }
  0x32   :  { %685 = vsyncadd [#allocation8], 4294966272  ;;  %v692_v0 = vmov 0.0   ;;  %vm693_vm0 = vmmov 0   ;;  %v572_v1 = vld [vmem:[#allocation4 + $0x38] sm:$0xff]   ;;  %v573_v2 = vld [vmem:[#allocation4 + $0x30] sm:$0xff]  }
  0x33   :  { %504 = vmatprep.subr.bf16.mxu0 %v692_v0  ;;  %520 = vmatprep.mubr.msk.bf16.mxu0 %vm693_vm0, %v692_v0  ;;  %v574_v3 = vld [vmem:[#allocation4 + $0x28] sm:$0xff]   ;;  %v580_v4 = vld [vmem:[#allocation6 + $0x38] sm:$0xff]   ;;  %v575_v5 = vld [vmem:[#allocation4 + $0x20] sm:$0xff]  }
  0x34   :  { %524 = vmatprep.subr.bf16.mxu1 %v692_v0  ;;  %540 = vmatprep.mubr.msk.bf16.mxu1 %vm693_vm0, %v692_v0  ;;  %v581_v6 = vld [vmem:[#allocation6 + $0x30] sm:$0xff]   ;;  %v576_v7 = vld [vmem:[#allocation4 + $0x18] sm:$0xff]   ;;  %v582_v8 = vld [vmem:[#allocation6 + $0x28] sm:$0xff]  }
  0x35   :  { %505 = vmatpush3.bf16.msra.mxu0 %v572_v1  ;;  %525 = vmatpush3.bf16.msra.mxu1 %v580_v4  ;;  %v577_v9 = vld [vmem:[#allocation4 + $0x10] sm:$0xff]   ;;  %v583_v10 = vld [vmem:[#allocation6 + $0x20] sm:$0xff]   ;;  %v578_v11 = vld [vmem:[#allocation4 + $0x8] sm:$0xff]  }
  0x36   :  { %506 = vmatprep.subr.bf16.mxu0 %v692_v0  ;;  %526 = vmatprep.subr.bf16.mxu1 %v692_v0  ;;  %v584_v12 = vld [vmem:[#allocation6 + $0x18] sm:$0xff]   ;;  %v579_v13 = vld [vmem:[#allocation4] sm:$0xff]   ;;  %v585_v15 = vld [vmem:[#allocation6 + $0x10] sm:$0xff]  }
  0x37   :  { %v83_v14 = vld [vmem:[#allocation2] sm:$0xff]  ;;  %v586_v17 = vld [vmem:[#allocation6 + $0x8] sm:$0xff]   ;;  %v587_v18 = vld [vmem:[#allocation6] sm:$0xff]  }
  0x38   :  { %v84_v16 = vpack.c.bf16 %v83_v14, %v83_v14  ;;  %v588_v19 = vld [vmem:[#allocation7 + $0x38] sm:$0xff]   ;;  %v589_v20 = vld [vmem:[#allocation7 + $0x30] sm:$0xff]   ;;  %v590_v21 = vld [vmem:[#allocation7 + $0x28] sm:$0xff]  }
  0x39   :  { %507 = vmatpush3.bf16.msra.mxu0 %v573_v2  ;;  %527 = vmatpush3.bf16.msra.mxu1 %v581_v6  ;;  %v591_v22 = vld [vmem:[#allocation7 + $0x20] sm:$0xff]   ;;  %v592_v23 = vld [vmem:[#allocation7 + $0x18] sm:$0xff]   ;;  %v593_v24 = vld [vmem:[#allocation7 + $0x10] sm:$0xff]  }
  0x3a   :  { %508 = vmatprep.subr.bf16.mxu0 %v692_v0  ;;  %528 = vmatprep.subr.bf16.mxu1 %v692_v0  ;;  %v449_v25 = vld [vmem:[%s807_s2] ss:$0 sm:$0xff]  ;;  %v594_v33 = vld [vmem:[#allocation7 + $0x8] sm:$0xff]   ;;  %v595_v34 = vld [vmem:[#allocation7] sm:$0xff]  }
  0x3b   :  { %v458_v35 = vld [vmem:[%s809_s4] ss:$0 sm:$0xff] }
  0x3c   :  { %v467_v43 = vld [vmem:[%s811_s6] ss:$0 sm:$0xff] }
  0x3d   :  { %509 = vmatpush3.bf16.msra.mxu0 %v574_v3  ;;  %529 = vmatpush3.bf16.msra.mxu1 %v582_v8  ;;  %v476_v53 = vld [vmem:[%s812_s7] ss:$0 sm:$0xff] }
  0x3e   :  { %510 = vmatprep.subr.bf16.mxu0 %v692_v0  ;;  %530 = vmatprep.subr.bf16.mxu1 %v692_v0 }
  0x41   :  { %511 = vmatpush3.bf16.msra.mxu0 %v575_v5  ;;  %531 = vmatpush3.bf16.msra.mxu1 %v583_v10 }
  0x42   :  { %512 = vmatprep.subr.bf16.mxu0 %v692_v0  ;;  %532 = vmatprep.subr.bf16.mxu1 %v692_v0 }
  0x45   :  { %513 = vmatpush3.bf16.msra.mxu0 %v576_v7  ;;  %533 = vmatpush3.bf16.msra.mxu1 %v584_v12 }
  0x46   :  { %514 = vmatprep.subr.bf16.mxu0 %v692_v0  ;;  %534 = vmatprep.subr.bf16.mxu1 %v692_v0 }
  0x49   :  { %515 = vmatpush3.bf16.msra.mxu0 %v577_v9  ;;  %535 = vmatpush3.bf16.msra.mxu1 %v585_v15 }
  0x4a   :  { %516 = vmatprep.subr.bf16.mxu0 %v692_v0  ;;  %536 = vmatprep.subr.bf16.mxu1 %v692_v0 }
  0x4d   :  { %517 = vmatpush3.bf16.msra.mxu0 %v578_v11  ;;  %537 = vmatpush3.bf16.msra.mxu1 %v586_v17 }
  0x4e   :  { %518 = vmatprep.subr.bf16.mxu0 %v692_v0  ;;  %538 = vmatprep.subr.bf16.mxu1 %v692_v0 }
  0x51   :  { %519 = vmatpush3.bf16.msra.mxu0 %v579_v13  ;;  %539 = vmatpush3.bf16.msra.mxu1 %v587_v18 }
  0x52   :  { %544 = vmatprep.subr.bf16.mxu0 %v692_v0 }
  0x54   :  { %521 = vmatmul.mubr.bf16.vlgmr.msra.gmra.mxu0 %v84_v16 }
  0x55   :  { %560 = vmatprep.mubr.msk.bf16.mxu0 %vm693_vm0, %v692_v0  ;;  %545 = vmatpush3.bf16.msra.mxu0 %v588_v19 }
  0x56   :  { %546 = vmatprep.subr.bf16.mxu0 %v692_v0 }
  0x59   :  { %547 = vmatpush3.bf16.msra.mxu0 %v589_v20 }
  0x5a   :  { %548 = vmatprep.subr.bf16.mxu0 %v692_v0 }
  0x5d   :  { %549 = vmatpush3.bf16.msra.mxu0 %v590_v21 }
  0x5e   :  { %550 = vmatprep.subr.bf16.mxu0 %v692_v0 }
  0x61   :  { %551 = vmatpush3.bf16.msra.mxu0 %v591_v22 }
  0x62   :  { %552 = vmatprep.subr.bf16.mxu0 %v692_v0 }
  0x65   :  { %553 = vmatpush3.bf16.msra.mxu0 %v592_v23 }
  0x66   :  { %554 = vmatprep.subr.bf16.mxu0 %v692_v0 }
  0x69   :  { %555 = vmatpush3.bf16.msra.mxu0 %v593_v24 }
  0x6a   :  { %556 = vmatprep.subr.bf16.mxu0 %v692_v0 }
  0x6d   :  { %557 = vmatpush3.bf16.msra.mxu0 %v594_v33 }
  0x6e   :  { %558 = vmatprep.subr.bf16.mxu0 %v692_v0 }
  0x71   :  { %559 = vmatpush3.bf16.msra.mxu0 %v595_v34 }
 0x114   :  { %v190_v26 = vpop.f32.mrf.mxu0 }
 0x115   :  { %v191_v27 = vadd.f32 %v449_v25, %v190_v26 }
 0x116   :  { %v522_v28 = vpop.f32.mrf.mxu0 }
 0x117   :  { %v196_v29 = vmax.f32 %v191_v27, 0.0 }
 0x118   :  { %v193_v30 = vpop.f32.mrf.mxu0 }
 0x119   :  { %v197_v31 = vpack.c.bf16 %v196_v29, %v196_v29 }
 0x11a   :  { %v523_v32 = vpop.f32.mrf.mxu0 }
 0x11b   :  { %541 = vmatmul.mubr.bf16.vlgmr.msra.gmra.mxu1 %v197_v31 }
 0x1db   :  { %v303_v36 = vpop.f32.mrf.mxu1 }
 0x1dc   :  { %v304_v37 = vadd.f32 %v458_v35, %v303_v36 }
 0x1dd   :  { %v542_v38 = vpop.f32.mrf.mxu1 }
 0x1de   :  { %v309_v39 = vmax.f32 %v304_v37, 0.0 }
 0x1df   :  { %v306_v40 = vpop.f32.mrf.mxu1 }
 0x1e0   :  { %v310_v41 = vpack.c.bf16 %v309_v39, %v309_v39 }
 0x1e1   :  { %v543_v42 = vpop.f32.mrf.mxu1 }
 0x1e2   :  { %561 = vmatmul.mubr.bf16.vlgmr.msra.gmra.mxu0 %v310_v41 }
 0x2a2   :  { %v416_v44 = vpop.f32.mrf.mxu0 }
 0x2a3   :  { %v417_v45 = vadd.f32 %v467_v43, %v416_v44 }
 0x2a4   :  { %v562_v46 = vpop.f32.mrf.mxu0 }
 0x2a5   :  { %v422_v47 = vmax.f32 %v417_v45, 0.0 }
 0x2a6   :  { %v419_v48 = vpop.f32.mrf.mxu0 }
 0x2a7   :  { %423 = vmax.xlane.f32.xlu0 %v422_v47 }
 0x2a8   :  { %v563_v49 = vpop.f32.mrf.mxu0 }
 0x330   :  { %v424_v50 = vpop.xlane.xlu0 %423 }
 0x331   :  { %v425_v51 = vsub.f32 %v422_v47, %v424_v50 }
 0x333   :  { %v426_v52 = vmul.f32 1.442695, %v425_v51 }
 0x335   :  { %596 = vpow2.f32 %v426_v52 }
 0x342   :  { %v597_v54 = vpop.eup %596 }
 0x343   :  { %v435_v55 = vmul.f32 %v597_v54, %v476_v53 }
 0x345   :  { %436 = vadd.xlane.f32.xlu0 %v435_v55 }
 0x3ce   :  { %v437_v56 = vpop.xlane.xlu0 %436 }
 0x3cf   :  { %598 = vrcp.f32 %v437_v56 }
 0x3dc   :  { %v599_v57 = vpop.eup %598 }
 0x3dd   :  { %v439_v58 = vmul.f32 %v599_v57, %v435_v55 }
 0x3df   :  { %v440_v59 = vpack.c.bf16 %v439_v58, %v439_v58 }
 0x3e1   :  { %441 = vst [vmem:[%s813_s8] sm:$0xf] %v440_v59 }
 0x3e2   :  { %446 = vsyncpa [#allocation3], 1 }
 0x3e3   :  { %447 = vsyncpa [#allocation5], 1 }
 0x3e4   :  { %448 = vsyncpa [#allocation8], 1 }

</bundles_post_ra>
